<compile_context>
chip_gen: v6e
topology: v6e:2x2x1
jax: 0.10.0
libtpu: 0.0.40
codegen_flags: <defaults>
</compile_context>

<pallas_src>
import functools
import math

import jax
import jax.numpy as jnp
from jax.experimental import pallas as pl
from jax.experimental.pallas import tpu as pltpu

# ---- module hyperparameters (match TimestepEmbedder defaults) ----
FREQ_EMB_SIZE = 256          # frequency_embedding_size (assumed even)
DIM = 32                     # MLP hidden / output dim (small for the demo)
MAX_TIMESTEP = 1000.0        # max_timestep
MAX_PERIOD = 256.0           # timestep_embedding(..., max_period=256) default

LANE = 128                   # TPU lane width
TILE_N_MAX = 1024            # max rows per grid step (f32 sublane multiple of 8)
MATMUL_DTYPE = jnp.bfloat16  # MXU operand dtype (f32 accumulate); f32 for parity


def _round_up(x, m):
    return (x + m - 1) // m * m


def _cdiv(a, b):
    return (a + b - 1) // b


def _choose_tile_n(n):
    """Balanced row tiles: minimal padding, <= TILE_N_MAX rows/tile, and >=2
    grid steps whenever more than one sublane tile of rows exists (v7x cores)."""
    n8 = _round_up(max(n, 1), 8)
    num_tiles = max(_cdiv(n8, TILE_N_MAX), 2 if n8 > 8 else 1)
    return _round_up(_cdiv(n8, num_tiles), 8)


def timestep_embedder_kernel(t_ref, freqs_ref, phase_ref, w1_ref, b1_ref,
                             w2_ref, b2_ref, o_ref):
    """t_ref: (tile_n, 1) f32 timesteps.
    freqs_ref: (1, FREQ) f32 = [freqs, freqs] with the 1000/max_timestep scale
    folded in; phase_ref: (1, FREQ) f32 = [0, ..., -pi/2, ...].
    w1_ref: (FREQ, dim_pad) bf16; w2_ref: (dim_pad, dim_pad) bf16;
    b1_ref/b2_ref: (1, dim_pad) f32; o_ref: (tile_n, dim_pad) f32."""
    t = t_ref[...]                                          # (tile_n, 1) f32

    # Single-pass sinusoid: concat([cos(a), sin(a)]) == cos(a + [0, -pi/2]).
    # Argument math kept in f32 (magnitudes up to ~1000).
    args = t * freqs_ref[...] + phase_ref[...]              # (tile_n, FREQ) f32
    emb = jnp.cos(args)                                     # EUP transcendentals

    # One K=FREQ (=256) bf16 matmul — fills the 256-deep v6e/v7x MXU.
    h = (jnp.dot(emb.astype(w1_ref.dtype), w1_ref[...],
                 preferred_element_type=jnp.float32)
         + b1_ref[...])                                     # (tile_n, dim_pad) f32

    h = h * jax.nn.sigmoid(h)                               # SiLU in f32 (padded cols stay 0)

    out = (jnp.dot(h.astype(w2_ref.dtype), w2_ref[...],
                   preferred_element_type=jnp.float32)
           + b2_ref[...])
    o_ref[...] = out.astype(o_ref.dtype)                    # lane-dense unmasked store


def prepare_timestep_embedder_params(w1_t, b1, w2_t, b2,
                                     max_timestep=MAX_TIMESTEP,
                                     max_period=MAX_PERIOD,
                                     matmul_dtype=MATMUL_DTYPE):
    """ONE-TIME (init-time) parameter prep, hoisted out of the hot path.

    w1_t: (FREQ, dim) Linear weight transposed to (in, out); b1: (dim,);
    w2_t: (dim, dim); b2: (dim,). Returns arrays ready for `timestep_embedder`:
    freq/phase tables, out-features zero-padded to a lane-dense multiple of
    128, and weights cast to the MXU operand dtype."""
    freq, dim = w1_t.shape
    assert freq % 2 == 0, "frequency_embedding_size must be even"
    # TODO(synk): odd frequency_embedding_size zero-pad branch not implemented.
    half = freq // 2
    dim_pad = _round_up(dim, LANE)
    pad_cols = dim_pad - dim

    freqs = ((1000.0 / max_timestep)
             * jnp.exp((-math.log(max_period) / half)
                       * jnp.arange(half, dtype=jnp.float32)))
    freqs_cat = jnp.concatenate([freqs, freqs]).reshape(1, freq)
    phase = jnp.concatenate(
        [jnp.zeros((half,), jnp.float32),
         jnp.full((half,), -0.5 * math.pi, jnp.float32)]).reshape(1, freq)

    w1p = jnp.pad(w1_t.astype(jnp.float32),
                  ((0, 0), (0, pad_cols))).astype(matmul_dtype)
    w2p = jnp.pad(w2_t.astype(jnp.float32),
                  ((0, pad_cols), (0, pad_cols))).astype(matmul_dtype)
    b1p = jnp.pad(b1.astype(jnp.float32), (0, pad_cols)).reshape(1, dim_pad)
    b2p = jnp.pad(b2.astype(jnp.float32), (0, pad_cols)).reshape(1, dim_pad)
    return freqs_cat, phase, w1p, b1p, w2p, b2p


@functools.partial(jax.jit, static_argnames=("dim",))
def timestep_embedder(t, freqs_cat, phase, w1p, b1p, w2p, b2p, *, dim):
    """Hot path. t: (N,) f32 timesteps in [0, max_timestep]; remaining args
    come from prepare_timestep_embedder_params(). Returns (N, dim) f32."""
    n = t.shape[0]
    freq = freqs_cat.shape[1]
    dim_pad = w1p.shape[1]

    tile_n = _choose_tile_n(n)
    n_pad = _round_up(max(n, 1), tile_n)
    grid_n = n_pad // tile_n

    # Cheap pad + reshape (no scatter); padded rows are sliced off below.
    t2d = jnp.pad(t.astype(jnp.float32), (0, n_pad - n)).reshape(n_pad, 1)

    out_pad = pl.pallas_call(
        timestep_embedder_kernel,
        out_shape=jax.ShapeDtypeStruct((n_pad, dim_pad), jnp.float32),
        grid_spec=pltpu.PrefetchScalarGridSpec(
            num_scalar_prefetch=0,
            grid=(grid_n,),
            in_specs=[
                pl.BlockSpec((tile_n, 1), lambda i: (i, 0)),         # t (per-step DMA)
                pl.BlockSpec((1, freq), lambda i: (0, 0)),           # [freqs, freqs]
                pl.BlockSpec((1, freq), lambda i: (0, 0)),           # [0, -pi/2]
                pl.BlockSpec((freq, dim_pad), lambda i: (0, 0)),     # W1 padded (bf16)
                pl.BlockSpec((1, dim_pad), lambda i: (0, 0)),        # b1 (f32)
                pl.BlockSpec((dim_pad, dim_pad), lambda i: (0, 0)),  # W2 padded (bf16)
                pl.BlockSpec((1, dim_pad), lambda i: (0, 0)),        # b2 (f32)
            ],
            out_specs=pl.BlockSpec((tile_n, dim_pad), lambda i: (i, 0)),
        ),
        compiler_params=pltpu.CompilerParams(
            dimension_semantics=("parallel",),   # shards rows across v7x's 2 TCs
        ),
        cost_estimate=pl.CostEstimate(
            flops=2 * n_pad * dim_pad * (freq + dim_pad),
            transcendentals=n_pad * (freq + dim_pad),     # cos + sigmoid
            bytes_accessed=4 * n_pad * (1 + dim_pad)
                           + 2 * (freq * dim_pad + dim_pad * dim_pad)
                           + 4 * (2 * freq + 2 * dim_pad),
        ),
    )(t2d, freqs_cat, phase, w1p, b1p, w2p, b2p)

    return out_pad[:n, :dim]


def _xavier_uniform(key, fan_in, fan_out):
    """Matches nn.init.xavier_uniform_ bound; returned as (in, out) layout."""
    bound = math.sqrt(6.0 / (fan_in + fan_out))
    return jax.random.uniform(key, (fan_in, fan_out), jnp.float32, -bound, bound)


def _reference(t, w1_t, b1, w2_t, b2):
    """Pure-JAX f32 reference of TimestepEmbedder.forward (per-timestep path)."""
    half = FREQ_EMB_SIZE // 2
    freqs = (1000.0 / MAX_TIMESTEP) * jnp.exp(
        -math.log(MAX_PERIOD) * jnp.arange(half, dtype=jnp.float32) / half)
    args = t[:, None].astype(jnp.float32) * freqs[None]
    emb = jnp.concatenate([jnp.cos(args), jnp.sin(args)], axis=-1)
    h = emb @ w1_t + b1
    h = h * jax.nn.sigmoid(h)
    return h @ w2_t + b2


if __name__ == "__main__":
    key = jax.random.PRNGKey(0)
    k_t, k_w1, k_w2 = jax.random.split(key, 3)

    N = 8
    # timesteps in [0, max_timestep]
    t = jax.random.uniform(k_t, (N,), jnp.float32, 0.0, MAX_TIMESTEP)

    # Deterministic xavier-uniform weights (zero biases), stored as (in, out).
    w1_t = _xavier_uniform(k_w1, FREQ_EMB_SIZE, DIM)   # Linear(FREQ -> DIM)
    b1 = jnp.zeros((DIM,), jnp.float32)
    w2_t = _xavier_uniform(k_w2, DIM, DIM)             # Linear(DIM -> DIM)
    b2 = jnp.zeros((DIM,), jnp.float32)

    # One-time parameter preparation (outside the hot path).
    params = prepare_timestep_embedder_params(w1_t, b1, w2_t, b2)

    out = timestep_embedder(t, *params, dim=DIM)
    out = jax.block_until_ready(out)

    ref = _reference(t, w1_t, b1, w2_t, b2)
    assert out.shape == (N, DIM)
    assert bool(jnp.all(jnp.isfinite(out)))
    # bf16 MXU operands vs. f32 reference -> bf16-level tolerance.
    max_err = float(jnp.max(jnp.abs(out - ref)))
    assert jnp.allclose(out, ref, atol=3e-2, rtol=3e-2), \
        f"mismatch vs reference: max abs err {max_err}"

    # TODO(synk): temb_as_tokens=True path (splitting into [1,1,dim] tokens) is
    # pure reshape glue and is left outside the kernel.
    print("KERNEL_OK")
</pallas_src>

<mosaic_0001>
module attributes {stable_mosaic.version = 11 : i64} {
  func.func @timestep_embedder_kernel(%arg0: i32, %arg1: memref<8x1xf32, #tpu.memory_space<vmem>>, %arg2: memref<1x256xf32, #tpu.memory_space<vmem>>, %arg3: memref<1x256xf32, #tpu.memory_space<vmem>>, %arg4: memref<256x128xbf16, #tpu.memory_space<vmem>>, %arg5: memref<1x128xf32, #tpu.memory_space<vmem>>, %arg6: memref<128x128xbf16, #tpu.memory_space<vmem>>, %arg7: memref<1x128xf32, #tpu.memory_space<vmem>>, %arg8: memref<8x128xf32, #tpu.memory_space<vmem>>) attributes {dimension_semantics = [#tpu.dimension_semantics<parallel>], iteration_bounds = array<i64: 1>, scalar_prefetch = 0 : i64, scratch_operands = 0 : i64, tpu.core_type = #tpu.core_type<tc>, window_params = [{transform_indices = @transform_0, window_bounds = array<i64: 8, 1>}, {pipeline_mode = #tpu.pipeline_mode<synchronous>, transform_indices = @transform_1, window_bounds = array<i64: 1, 256>}, {pipeline_mode = #tpu.pipeline_mode<synchronous>, transform_indices = @transform_2, window_bounds = array<i64: 1, 256>}, {pipeline_mode = #tpu.pipeline_mode<synchronous>, transform_indices = @transform_3, window_bounds = array<i64: 256, 128>}, {pipeline_mode = #tpu.pipeline_mode<synchronous>, transform_indices = @transform_4, window_bounds = array<i64: 1, 128>}, {pipeline_mode = #tpu.pipeline_mode<synchronous>, transform_indices = @transform_5, window_bounds = array<i64: 128, 128>}, {pipeline_mode = #tpu.pipeline_mode<synchronous>, transform_indices = @transform_6, window_bounds = array<i64: 1, 128>}, {transform_indices = @transform_7, window_bounds = array<i64: 8, 128>}]} {
    %c0 = arith.constant 0 : index
    %c0_0 = arith.constant 0 : index
    %0 = vector.load %arg1[%c0, %c0_0] : memref<8x1xf32, #tpu.memory_space<vmem>>, vector<8x1xf32>
    %c0_1 = arith.constant 0 : index
    %c0_2 = arith.constant 0 : index
    %1 = vector.load %arg2[%c0_1, %c0_2] : memref<1x256xf32, #tpu.memory_space<vmem>>, vector<1x256xf32>
    %2 = vector.broadcast %0 : vector<8x1xf32> to vector<8x256xf32>
    %3 = vector.broadcast %1 : vector<1x256xf32> to vector<8x256xf32>
    %4 = arith.mulf %2, %3 : vector<8x256xf32>
    %c0_3 = arith.constant 0 : index
    %c0_4 = arith.constant 0 : index
    %5 = vector.load %arg3[%c0_3, %c0_4] : memref<1x256xf32, #tpu.memory_space<vmem>>, vector<1x256xf32>
    %6 = vector.broadcast %5 : vector<1x256xf32> to vector<8x256xf32>
    %7 = arith.addf %4, %6 : vector<8x256xf32>
    %8 = math.cos %7 : vector<8x256xf32>
    %9 = arith.truncf %8 : vector<8x256xf32> to vector<8x256xbf16>
    %c0_5 = arith.constant 0 : index
    %c0_6 = arith.constant 0 : index
    %10 = vector.load %arg4[%c0_5, %c0_6] : memref<256x128xbf16, #tpu.memory_space<vmem>>, vector<256x128xbf16>
    %cst = arith.constant dense<0.000000e+00> : vector<8x128xf32>
    %11 = tpu.matmul %9, %10, %cst {dimension_numbers = #tpu.dot_dimension_numbers<[1], [0], [0], [1], [0, 0, 1, 1], [], []>} : vector<8x256xbf16>, vector<256x128xbf16>, vector<8x128xf32> -> vector<8x128xf32>
    %c0_7 = arith.constant 0 : index
    %c0_8 = arith.constant 0 : index
    %12 = vector.load %arg5[%c0_7, %c0_8] : memref<1x128xf32, #tpu.memory_space<vmem>>, vector<1x128xf32>
    %13 = vector.broadcast %12 : vector<1x128xf32> to vector<8x128xf32>
    %14 = arith.addf %11, %13 : vector<8x128xf32>
    %15 = arith.negf %14 : vector<8x128xf32>
    %16 = math.exp %15 : vector<8x128xf32>
    %cst_9 = arith.constant 1.000000e+00 : f32
    %17 = vector.broadcast %cst_9 : f32 to vector<8x128xf32>
    %18 = arith.addf %17, %16 : vector<8x128xf32>
    %19 = arith.divf %17, %18 : vector<8x128xf32>
    %20 = arith.mulf %14, %19 : vector<8x128xf32>
    %21 = arith.truncf %20 : vector<8x128xf32> to vector<8x128xbf16>
    %c0_10 = arith.constant 0 : index
    %c0_11 = arith.constant 0 : index
    %22 = vector.load %arg6[%c0_10, %c0_11] : memref<128x128xbf16, #tpu.memory_space<vmem>>, vector<128x128xbf16>
    %cst_12 = arith.constant dense<0.000000e+00> : vector<8x128xf32>
    %23 = tpu.matmul %21, %22, %cst_12 {dimension_numbers = #tpu.dot_dimension_numbers<[1], [0], [0], [1], [0, 0, 1, 1], [], []>} : vector<8x128xbf16>, vector<128x128xbf16>, vector<8x128xf32> -> vector<8x128xf32>
    %c0_13 = arith.constant 0 : index
    %c0_14 = arith.constant 0 : index
    %24 = vector.load %arg7[%c0_13, %c0_14] : memref<1x128xf32, #tpu.memory_space<vmem>>, vector<1x128xf32>
    %25 = vector.broadcast %24 : vector<1x128xf32> to vector<8x128xf32>
    %26 = arith.addf %23, %25 : vector<8x128xf32>
    %c0_15 = arith.constant 0 : index
    %c0_16 = arith.constant 0 : index
    %27 = vector.load %arg8[%c0_15, %c0_16] : memref<8x128xf32, #tpu.memory_space<vmem>>, vector<8x128xf32>
    tpu.vector_store %arg8[%c0_15, %c0_16], %26 {strides = array<i32>} : memref<8x128xf32, #tpu.memory_space<vmem>>, vector<8x128xf32>,
    return
  }
  func.func @transform_0(%arg0: i32) -> (i32, i32) {
    %c0_i32 = arith.constant 0 : i32
    %c0_i32_0 = arith.constant 0 : i32
    return %arg0, %c0_i32 : i32, i32
  }
  func.func @transform_1(%arg0: i32) -> (i32, i32) {
    %c0_i32 = arith.constant 0 : i32
    %c0_i32_0 = arith.constant 0 : i32
    %c0_i32_1 = arith.constant 0 : i32
    return %c0_i32, %c0_i32_0 : i32, i32
  }
  func.func @transform_2(%arg0: i32) -> (i32, i32) {
    %c0_i32 = arith.constant 0 : i32
    %c0_i32_0 = arith.constant 0 : i32
    %c0_i32_1 = arith.constant 0 : i32
    return %c0_i32, %c0_i32_0 : i32, i32
  }
  func.func @transform_3(%arg0: i32) -> (i32, i32) {
    %c0_i32 = arith.constant 0 : i32
    %c0_i32_0 = arith.constant 0 : i32
    %c0_i32_1 = arith.constant 0 : i32
    return %c0_i32, %c0_i32_0 : i32, i32
  }
  func.func @transform_4(%arg0: i32) -> (i32, i32) {
    %c0_i32 = arith.constant 0 : i32
    %c0_i32_0 = arith.constant 0 : i32
    %c0_i32_1 = arith.constant 0 : i32
    return %c0_i32, %c0_i32_0 : i32, i32
  }
  func.func @transform_5(%arg0: i32) -> (i32, i32) {
    %c0_i32 = arith.constant 0 : i32
    %c0_i32_0 = arith.constant 0 : i32
    %c0_i32_1 = arith.constant 0 : i32
    return %c0_i32, %c0_i32_0 : i32, i32
  }
  func.func @transform_6(%arg0: i32) -> (i32, i32) {
    %c0_i32 = arith.constant 0 : i32
    %c0_i32_0 = arith.constant 0 : i32
    %c0_i32_1 = arith.constant 0 : i32
    return %c0_i32, %c0_i32_0 : i32, i32
  }
  func.func @transform_7(%arg0: i32) -> (i32, i32) {
    %c0_i32 = arith.constant 0 : i32
    %c0_i32_0 = arith.constant 0 : i32
    return %arg0, %c0_i32 : i32, i32
  }
}

</mosaic_0001>

<bundles_post_ra>
// kernel: timestep_embedder.1
= control target key start
LH: loop header
LB: loop body
LE: loop exit
PB: predicated region body
PF: predicated region fallthrough
CT: control target
= control target key end

     0   :  { %12 = vsyncpa [#allocation3], 0  ;;  %s985_s0 = inlined_call_operand.vmem [shape: f32[8,1], index: 0, kind: input, shape index: {}]   ;;  %s986_s1 = inlined_call_operand.vmem [shape: f32[1,256], index: 1, kind: input, shape index: {}]   ;;  %s987_s2 = inlined_call_operand.vmem [shape: f32[1,256], index: 2, kind: input, shape index: {}]   ;;  %s988_s3 = inlined_call_operand.hbm [shape: bf16[256,128], index: 3, kind: input, shape index: {}]   ;;  %s989_s4 = inlined_call_operand.vmem [shape: f32[1,128], index: 4, kind: input, shape index: {}]   ;;  %s990_s5 = inlined_call_operand.hbm [shape: bf16[128,128], index: 5, kind: input, shape index: {}]   ;;  %s991_s6 = inlined_call_operand.vmem [shape: f32[1,128], index: 6, kind: input, shape index: {}]   ;;  %s992_s7 = inlined_call_operand.hbm [shape: f32[8,128], index: 7, kind: output, shape index: {}]  }
   0x1   :  { %13 = vsyncpa [#allocation6], 0 }
   0x2   :  { %14 = vsyncpa [#allocation4], 0  ;;  %s820_s24 = smov [#allocation2]  }
   0x3   :  { %s26_s25 = sshll.u32 %s820_s24, 4  ;;  %s27_s25 = int_to_ptr.vmem [resolvable:$true] %s26_s25 }
   0x4   :  { %s762_s26 = scalar_lea.vmem %s27_s25, 2048  ;;  %p767_p1 = scmp.lt.s32.totalorder %s27_s25, %s27_s25 }
   0x5   :  { %p763_p0 = scmp.ne.s32.totalorder %s27_s25, %s762_s26  ;;  %p768_p2 = scmp.lt.s32.totalorder %s762_s26, %s762_s26 }
   0x7   :  { %p769_p3 = por %p768_p2, %p767_p1 }
   0x9   :  { %p770_p4 = pnand %p769_p3, %p763_p0 }
   0xb   :  { %773 = shalt.err (!%p770_p4)
}
   0xc   :  { %s821_s27 = smov 64   ;;  %s822_s28 = smov 4  }
   0xd   :  { %32 = dma.hbm_to_vmem [thread:$0]  %s988_s3, 2048, %s27_s25, [#allocation3], %s821_s27, %s821_s27, %s822_s28  }
   0xe   :  { %s823_s8 = smov [#allocation5]  }
   0xf   :  { %s40_s9 = sshll.u32 %s823_s8, 4  ;;  %s41_s9 = int_to_ptr.vmem [resolvable:$true] %s40_s9 }
  0x10   :  { %s782_s10 = scalar_lea.vmem %s41_s9, 1024  ;;  %p787_p6 = scmp.lt.s32.totalorder %s41_s9, %s41_s9 }
  0x11   :  { %p783_p5 = scmp.ne.s32.totalorder %s41_s9, %s782_s10  ;;  %p788_p7 = scmp.lt.s32.totalorder %s782_s10, %s782_s10 }
  0x13   :  { %p789_p8 = por %p788_p7, %p787_p6 }
  0x15   :  { %p790_p9 = pnand %p789_p8, %p783_p5 }
  0x17   :  { %793 = shalt.err (!%p790_p9)
}
  0x18   :  { %46 = dma.hbm_to_vmem [thread:$0]  %s990_s5, 1024, %s41_s9, [#allocation6], %s821_s27, %s821_s27, %s822_s28  }
  0x19   :  { %814 = dma.done.wait [#allocation3], 2048  }
  0x1a   :  { %815 = vsyncadd [#allocation3], 4294965248 }
  0x1b   :  { %816 = dma.done.wait [#allocation6], 1024  }
  0x1c   :  { %817 = vsyncadd [#allocation6], 4294966272  ;;  %v824_v0 = vmov 0   ;;  %v56_v1 = vld [vmem:[%s985_s0] sm:$0xff]  ;;  %v718_v2 = vld [vmem:[#allocation2 + $0x78] sm:$0xff]   ;;  %v64_v18 = vlaneseq  ;;  %s833_s18 = smov [#allocation7]  }
  0x1d   :  { %717 = vset.pattern.permute.xlu0 %v824_v0  ;;  %v719_v3 = vld [vmem:[#allocation2 + $0x38] sm:$0xff]   ;;  %644 = vmatprep.subr.bf16.mxu0 %v718_v2  ;;  %v720_v4 = vld [vmem:[#allocation2 + $0x70] sm:$0xff]   ;;  %v722_v6 = vld [vmem:[#allocation2 + $0x68] sm:$0xff]   ;;  %v825_v53 = vmov 683565275  }
  0x1e   :  { %60 = vperm.xlu0 %717, %v56_v1   ;;  %645 = vmatpush3.bf16.msra.mxu0 %v719_v3  ;;  %v721_v5 = vld [vmem:[#allocation2 + $0x30] sm:$0xff]   ;;  %v723_v7 = vld [vmem:[#allocation2 + $0x28] sm:$0xff]   ;;  %v724_v8 = vld [vmem:[#allocation2 + $0x60] sm:$0xff]   ;;  %v65_v19 = vshrl.u32 %v64_v18, 7  ;;  %v826_v57 = vmov 2475754826  }
  0x1f   :  { %646 = vmatprep.subr.bf16.mxu0 %v720_v4  ;;  %v725_v9 = vld [vmem:[#allocation2 + $0x20] sm:$0xff]   ;;  %v726_v10 = vld [vmem:[#allocation2 + $0x58] sm:$0xff]   ;;  %v728_v12 = vld [vmem:[#allocation2 + $0x50] sm:$0xff]   ;;  %v827_v59 = vmov 2131351028  }
  0x20   :  { %v727_v11 = vld [vmem:[#allocation2 + $0x18] sm:$0xff]   ;;  %v729_v13 = vld [vmem:[#allocation2 + $0x10] sm:$0xff]   ;;  %v730_v14 = vld [vmem:[#allocation2 + $0x48] sm:$0xff]   ;;  %v66_v20 = vsub.s32 0, %v65_v19  ;;  %v70_v21 = vsub.s32 1, %v65_v19 }
  0x21   :  { %v731_v15 = vld [vmem:[#allocation2 + $0x8] sm:$0xff]   ;;  %v732_v16 = vld [vmem:[#allocation2 + $0x40] sm:$0xff]   ;;  %v828_v61 = vmov 2102212464   ;;  %v829_v63 = vmov 920167782  }
  0x22   :  { %647 = vmatpush3.bf16.msra.mxu0 %v721_v5  ;;  %v733_v17 = vld [vmem:[#allocation2] sm:$0xff]  }
  0x23   :  { %648 = vmatprep.subr.bf16.mxu0 %v722_v6  ;;  %v57_v22 = vld [vmem:[%s986_s1] sm:$0x3]  ;;  %v830_v6 = vmov 1326507024  }
  0x24   :  { %v76_v23 = vld [vmem:[%s987_s2] sm:$0x3]  ;;  %v67_v24 = vrot.slane %v57_v22, %v66_v20  ;;  %v71_v25 = vrot.slane %v57_v22, %v70_v21 }
  0x25   :  { %v81_v26 = vrot.slane %v76_v23, %v66_v20  ;;  %v85_v27 = vrot.slane %v76_v23, %v70_v21 }
  0x26   :  { %649 = vmatpush3.bf16.msra.mxu0 %v723_v7 }
  0x27   :  { %650 = vmatprep.subr.bf16.mxu0 %v724_v8 }
  0x2a   :  { %651 = vmatpush3.bf16.msra.mxu0 %v725_v9 }
  0x2b   :  { %652 = vmatprep.subr.bf16.mxu0 %v726_v10 }
  0x2e   :  { %653 = vmatpush3.bf16.msra.mxu0 %v727_v11 }
  0x2f   :  { %654 = vmatprep.subr.bf16.mxu0 %v728_v12 }
  0x32   :  { %655 = vmatpush3.bf16.msra.mxu0 %v729_v13 }
  0x33   :  { %656 = vmatprep.subr.bf16.mxu0 %v730_v14 }
  0x36   :  { %657 = vmatpush3.bf16.msra.mxu0 %v731_v15 }
  0x37   :  { %658 = vmatprep.subr.bf16.mxu0 %v732_v16 }
  0x3a   :  { %659 = vmatpush3.bf16.msra.mxu0 %v733_v17 }
  0x99   :  { %v61_v28 = vpop.permute.xlu0 %60 }
  0x9a   :  { %v74_v29 = vmul.f32 %v67_v24, %v61_v28  ;;  %v75_v30 = vmul.f32 %v71_v25, %v61_v28 }
  0x9c   :  { %v889_v31 = vadd.f32 %v81_v26, %v74_v29  ;;  %v891_v32 = vadd.f32 %v85_v27, %v75_v30 }
  0x9e   :  { %v90_v33 = vand.u32 2147483647, %v889_v31  ;;  %v93_v34 = vand.u32 2139095040, %v889_v31  ;;  %v196_v35 = vand.u32 2139095040, %v891_v32  ;;  %v193_v39 = vand.u32 2147483647, %v891_v32 }
  0x9f   :  { %vm92_vm14 = vcmp.lt.s32.totalorder %v889_v31, 0 }
  0xa0   :  { %v94_v36 = vshrl.u32 %v93_v34, 23  ;;  %v197_v37 = vshrl.u32 %v196_v35, 23  ;;  %v97_v38 = vand.u32 8388607, %v90_v33  ;;  %v901_v45 = vand.u32 8388607, %v193_v39 }
  0xa1   :  { %vm949_vm15 = vcmp.le.f32.partialorder %v90_v33, 0.7853982 }
  0xa2   :  { %v609_v40 = vadd.s32 4294967169, %v94_v36  ;;  %v613_v41 = vadd.s32 4294967169, %v197_v37  ;;  %v98_v44 = vor.u32 8388608, %v97_v38  ;;  %v201_v51 = vor.u32 8388608, %v901_v45 }
  0xa4   :  { %v100_v42 = vadd.s32 1, %v609_v40  ;;  %v203_v43 = vadd.s32 1, %v613_v41  ;;  %v903_v50 = vshll.u32 %v98_v44, 8  ;;  %v241_v45 = vshll.u32 %v201_v51, 8 }
  0xa6   :  { %vm101_vm0 = vcmp.gt.s32.totalorder %v100_v42, 0  ;;  %vm204_vm1 = vcmp.gt.s32.totalorder %v203_v43, 0 }
  0xa7   :  { %v102_v46 = vsel %vm101_vm0, %v100_v42, 0  ;;  %v205_v47 = vsel %vm204_vm1, %v203_v43, 0  ;;  %vm195_vm0 = vcmp.lt.s32.totalorder %v891_v32, 0  ;;  %vm960_vm1 = vcmp.le.f32.partialorder %v193_v39, 0.7853982 }
  0xa8   :  { %v103_v48 = vshrl.u32 %v102_v46, 5  ;;  %v104_v49 = vand.u32 31, %v102_v46  ;;  %v906_v55 = vshrl.u32 %v205_v47, 5  ;;  %v207_v56 = vand.u32 31, %v205_v47 }
  0xaa   :  { %v105_v52 = vsub.s32 32, %v104_v49  ;;  %v107_v54 = vshll.u32 %v825_v53, %v104_v49  ;;  %v110_v58 = vshll.u32 %v826_v57, %v104_v49  ;;  %v113_v60 = vshll.u32 %v827_v59, %v104_v49 }
  0xab   :  { %v116_v62 = vshll.u32 %v828_v61, %v104_v49  ;;  %v119_v0 = vshll.u32 %v829_v63, %v104_v49  ;;  %vm122_vm2 = vcmp.lt.s32.totalorder %v103_v48, 1  ;;  %vm123_vm3 = vcmp.lt.s32.totalorder %v103_v48, 2 }
  0xac   :  { %v108_v1 = vshrl.u32 %v826_v57, %v105_v52  ;;  %v111_v2 = vshrl.u32 %v827_v59, %v105_v52  ;;  %v114_v3 = vshrl.u32 %v828_v61, %v105_v52  ;;  %v106_v4 = vshrl.u32 %v825_v53, %v105_v52 }
  0xad   :  { %v117_v5 = vshrl.u32 %v829_v63, %v105_v52  ;;  %v120_v7 = vshrl.u32 %v830_v6, %v105_v52  ;;  %v208_v11 = vsub.s32 32, %v207_v56  ;;  %vm124_vm4 = vcmp.lt.s32.totalorder %v103_v48, 3 }
  0xae   :  { %v109_v8 = vor.u32 %v108_v1, %v107_v54  ;;  %v112_v9 = vor.u32 %v111_v2, %v110_v58  ;;  %v115_v10 = vor.u32 %v114_v3, %v113_v60  ;;  %vm125_vm5 = vcmp.lt.s32.totalorder %v103_v48, 4 }
  0xaf   :  { %v118_v12 = vor.u32 %v117_v5, %v116_v62  ;;  %v121_v13 = vor.u32 %v120_v7, %v119_v0  ;;  %v210_v21 = vshll.u32 %v825_v53, %v207_v56  ;;  %v211_v24 = vshrl.u32 %v826_v57, %v208_v11 }
  0xb0   :  { %v126_v14 = vsel %vm122_vm2, %v106_v4, %v109_v8  ;;  %v127_v15 = vsel %vm125_vm5, %v115_v10, 2102212464  ;;  %v130_v16 = vsel %vm122_vm2, %v109_v8, %v112_v9  ;;  %v134_v17 = vsel %vm122_vm2, %v112_v9, %v115_v10 }
  0xb1   :  { %v128_v18 = vsel %vm124_vm4, %v112_v9, %v127_v15  ;;  %v131_v19 = vsel %vm125_vm5, %v118_v12, 920167782  ;;  %v135_v20 = vsel %vm125_vm5, %v121_v13, 1326507024  ;;  %v213_v25 = vshll.u32 %v826_v57, %v207_v56 }
  0xb2   :  { %v132_v22 = vsel %vm124_vm4, %v115_v10, %v131_v19  ;;  %v136_v23 = vsel %vm124_vm4, %v118_v12, %v135_v20  ;;  %v129_v26 = vsel %vm123_vm3, %v126_v14, %v128_v18  ;;  %v214_v29 = vshrl.u32 %v827_v59, %v208_v11 }
  0xb3   :  { %v133_v27 = vsel %vm123_vm3, %v130_v16, %v132_v22  ;;  %v137_v28 = vsel %vm123_vm3, %v134_v17, %v136_v23  ;;  %v212_v37 = vor.u32 %v211_v24, %v210_v21  ;;  %v216_v40 = vshll.u32 %v827_v59, %v207_v56 }
  0xb4   :  { %v915_v30 = vmul.u32.u64.low %v903_v50, %v137_v28  ;;  %v916_v34 = vmul.u32.u64.high %v903_v50, %v137_v28, %v915_v30  ;;  %v919_v35 = vmul.u32.u64.low %v903_v50, %v133_v27  ;;  %v920_v36 = vmul.u32.u64.high %v903_v50, %v133_v27, %v919_v35 }
  0xb5   :  { %v215_v38 = vor.u32 %v214_v29, %v213_v25  ;;  %v217_v41 = vshrl.u32 %v828_v61, %v208_v11  ;;  %v219_v42 = vshll.u32 %v828_v61, %v207_v56  ;;  %v220_v43 = vshrl.u32 %v829_v63, %v208_v11 }
  0xb6   :  { %v223_v44 = vshrl.u32 %v830_v6, %v208_v11  ;;  %v145_v46 = vmul.u32 %v903_v50, %v129_v26  ;;  %v209_v47 = vshrl.u32 %v825_v53, %v208_v11  ;;  %v222_v49 = vshll.u32 %v829_v63, %v207_v56 }
  0xb7   :  { %v218_v48 = vor.u32 %v217_v41, %v216_v40  ;;  %vm147_vm6 = vc.u32 %v916_v34, %v919_v35  ;;  %v148_v52 = vadd.s32 1, %v920_v36  ;;  %v221_v54 = vor.u32 %v220_v43, %v219_v42 }
  0xb8   :  { %vm225_vm7 = vcmp.lt.s32.totalorder %v906_v55, 1  ;;  %v224_v57 = vor.u32 %v223_v44, %v222_v49  ;;  %vm227_vm8 = vcmp.lt.s32.totalorder %v906_v55, 3  ;;  %vm228_vm9 = vcmp.lt.s32.totalorder %v906_v55, 4 }
  0xb9   :  { %v233_v58 = vsel %vm225_vm7, %v212_v37, %v215_v38  ;;  %v149_v51 = vsel %vm147_vm6, %v148_v52, %v920_v36  ;;  %v230_v59 = vsel %vm228_vm9, %v218_v48, 2102212464  ;;  %v234_v50 = vsel %vm228_vm9, %v221_v54, 920167782 }
  0xba   :  { %v237_v53 = vsel %vm225_vm7, %v215_v38, %v218_v48  ;;  %v150_v60 = vadd.s32 %v149_v51, %v145_v46  ;;  %vm226_vm10 = vcmp.lt.s32.totalorder %v906_v55, 2  ;;  %v235_v56 = vsel %vm227_vm8, %v218_v48, %v234_v50 }
  0xbb   :  { %v238_v61 = vsel %vm228_vm9, %v224_v57, 1326507024  ;;  %v229_v62 = vsel %vm225_vm7, %v209_v47, %v212_v37  ;;  %v231_v63 = vsel %vm227_vm8, %v215_v38, %v230_v59  ;;  %v236_v0 = vsel %vm226_vm10, %v233_v58, %v235_v56 }
  0xbc   :  { %v239_v1 = vsel %vm227_vm8, %v221_v54, %v238_v61  ;;  %v151_v2 = vadd.s32 536870912, %v150_v60  ;;  %v930_v4 = vmul.u32.u64.low %v241_v45, %v236_v0  ;;  %v931_v5 = vmul.u32.u64.high %v241_v45, %v236_v0, %v930_v4 }
  0xbd   :  { %v240_v3 = vsel %vm226_vm10, %v237_v53, %v239_v1  ;;  %v232_v9 = vsel %vm226_vm10, %v229_v62, %v231_v63  ;;  %v146_v25 = vadd.s32 %v919_v35, %v916_v34  ;;  %vm182_vm6 = vweird.f32 %v889_v31 }
  0xbe   :  { %v933_v6 = vmul.u32.u64.low %v241_v45, %v240_v3  ;;  %v934_v7 = vmul.u32.u64.high %v241_v45, %v240_v3, %v933_v6  ;;  %v936_v8 = vshrl.u32 %v151_v2, 30  ;;  %v251_v55 = vadd.s32 1, %v931_v5 }
  0xbf   :  { %v248_v11 = vmul.u32 %v241_v45, %v232_v9  ;;  %vm285_vm9 = vweird.f32 %v891_v32  ;;  %vm832_vm10 = vmmov 0  }
  0xc0   :  { %v153_v10 = vshll.u32 %v936_v8, 30  ;;  %vm250_vm11 = vc.u32 %v934_v7, %v930_v4  ;;  %v249_v46 = vadd.s32 %v930_v4, %v934_v7  ;;  %v176_v62 = vsub.s32 4, %v936_v8 }
  0xc1   :  { %v252_v13 = vsel %vm250_vm11, %v251_v55, %v931_v5 }
  0xc2   :  { %v154_v12 = vsub.s32 %v150_v60, %v153_v10  ;;  %v253_v14 = vadd.s32 %v252_v13, %v248_v11  ;;  %v177_v2 = vsel %vm92_vm14, %v176_v62, %v936_v8 }
  0xc3   :  { %v179_v4 = vsel %vm949_vm15, 0, %v177_v2 }
  0xc4   :  { %v156_v15 = vsub.s32 0, %v154_v12  ;;  %v254_v16 = vadd.s32 536870912, %v253_v14  ;;  %v183_v7 = vand.u32 3, %v179_v4 }
  0xc6   :  { %v610_v17 = vmin.u32 %v156_v15, %v154_v12  ;;  %v255_v18 = vshrl.u32 %v254_v16, 30  ;;  %vm185_vm2 = vcmp.eq.s32.totalorder %v183_v7, 0  ;;  %vm188_vm3 = vcmp.eq.s32.totalorder %v183_v7, 2 }
  0xc7   :  { %vm184_vm4 = vcmp.lt.s32.totalorder %v183_v7, 2 }
  0xc8   :  { %v158_v19 = vclz %v610_v17  ;;  %v256_v20 = vshll.u32 %v255_v18, 30  ;;  %v279_v3 = vsub.s32 4, %v255_v18 }
  0xca   :  { %v611_v21 = vadd.s32 4294967294, %v158_v19  ;;  %v257_v22 = vsub.s32 %v253_v14, %v256_v20  ;;  %v280_v6 = vsel %vm195_vm0, %v279_v3, %v255_v18 }
  0xcb   :  { %v282_v55 = vsel %vm960_vm1, 0, %v280_v6 }
  0xcc   :  { %vm612_vm12 = vcmp.lt.s32.totalorder %v611_v21, 0  ;;  %v259_v24 = vsub.s32 0, %v257_v22  ;;  %v286_v8 = vand.u32 3, %v282_v55 }
  0xcd   :  { %v161_v23 = vsel %vm612_vm12, 0, %v611_v21 }
  0xce   :  { %v162_v26 = vsub.s32 32, %v161_v23  ;;  %v166_v27 = vsub.s32 4294967266, %v161_v23  ;;  %v614_v28 = vmin.u32 %v259_v24, %v257_v22  ;;  %v163_v29 = vshll.u32 %v154_v12, %v161_v23 }
  0xcf   :  { %vm291_vm5 = vcmp.eq.s32.totalorder %v286_v8, 2  ;;  %vm288_vm7 = vcmp.eq.s32.totalorder %v286_v8, 0  ;;  %vm287_vm8 = vcmp.lt.s32.totalorder %v286_v8, 2 }
  0xd0   :  { %v164_v30 = vshrl.u32 %v146_v25, %v162_v26  ;;  %v167_v36 = vadd.s32 127, %v166_v27  ;;  %v261_v37 = vclz %v614_v28  ;;  %v734_v25 = vld [vmem:[#allocation5 + $0x38] sm:$0xff]   ;;  %v831_v26 = vmov 0.0   ;;  %v735_v27 = vld [vmem:[#allocation5 + $0x30] sm:$0xff]   ;;  %v737_v28 = vld [vmem:[#allocation5 + $0x20] sm:$0xff]  }
  0xd1   :  { %675 = vmatprep.subr.bf16.mxu1 %v831_v26  ;;  %691 = vmatprep.mubr.msk.bf16.mxu1 %vm832_vm10, %v831_v26 }
  0xd2   :  { %v165_v38 = vor.u32 %v164_v30, %v163_v29  ;;  %v168_v40 = vshll.u32 %v167_v36, 23  ;;  %v615_v41 = vadd.s32 4294967294, %v261_v37  ;;  %676 = vmatpush3.bf16.msra.mxu1 %v734_v25  ;;  %v739_v29 = vld [vmem:[#allocation5 + $0x10] sm:$0xff]   ;;  %v740_v30 = vld [vmem:[#allocation5 + $0x8] sm:$0xff]   ;;  %v741_v36 = vld [vmem:[#allocation5] sm:$0xff]  }
  0xd3   :  { %677 = vmatprep.subr.bf16.mxu1 %v831_v26 }
  0xd4   :  { %v169_v42 = vor.u32 4788187, %v168_v40  ;;  %vm616_vm13 = vcmp.lt.s32.totalorder %v615_v41, 0  ;;  %v172_v44 = vcvt.s32.f32 %v165_v38  ;;  %v617_v38 = vld [vmem:[%s989_s4] ss:$0 sm:$0xff]  ;;  %s599_s4 = sshll.u32 %s833_s18, 4  ;;  %s600_s4 = int_to_ptr.vmem [resolvable:$true] %s599_s4 }
  0xd5   :  { %v264_v45 = vsel %vm616_vm13, 0, %v615_v41  ;;  %s794_s19 = scalar_lea.vmem %s600_s4, 128  ;;  %p799_p11 = scmp.lt.s32.totalorder %s600_s4, %s600_s4 }
  0xd6   :  { %v170_v43 = vand.u32 2147483647, %v169_v42  ;;  %v265_v47 = vsub.s32 32, %v264_v45  ;;  %v269_v48 = vsub.s32 4294967266, %v264_v45  ;;  %v266_v35 = vshll.u32 %v257_v22, %v264_v45  ;;  %678 = vmatpush3.bf16.msra.mxu1 %v735_v27  ;;  %p795_p10 = scmp.ne.s32.totalorder %s600_s4, %s794_s19  ;;  %p800_p12 = scmp.lt.s32.totalorder %s794_s19, %s794_s19 }
  0xd7   :  { %679 = vmatprep.subr.bf16.mxu1 %v831_v26 }
  0xd8   :  { %v173_v34 = vmul.f32 %v172_v44, %v170_v43  ;;  %v267_v49 = vshrl.u32 %v249_v46, %v265_v47  ;;  %v270_v52 = vadd.s32 127, %v269_v48  ;;  %p801_p13 = por %p800_p12, %p799_p11 }
  0xda   :  { %v174_v54 = vxor.u32 2147483648, %v173_v34  ;;  %v268_v57 = vor.u32 %v267_v49, %v266_v35  ;;  %v271_v58 = vshll.u32 %v270_v52, 23  ;;  %v635_v49 = vld [vmem:[%s991_s6] ss:$0 sm:$0xff]  ;;  %p802_p0 = pnand %p801_p13, %p795_p10 }
  0xdc   :  { %v175_v51 = vsel %vm92_vm14, %v174_v54, %v173_v34  ;;  %v272_v50 = vor.u32 4788187, %v271_v58  ;;  %v275_v56 = vcvt.s32.f32 %v268_v57 }
  0xdd   :  { %v178_v53 = vsel %vm949_vm15, %v889_v31, %v175_v51  ;;  %v736_v31 = vld [vmem:[#allocation5 + $0x28] sm:$0xff]  }
  0xde   :  { %742 = vcosq.f32 %v178_v53  ;;  %v273_v60 = vand.u32 2147483647, %v272_v50  ;;  %680 = vmatpush3.bf16.msra.mxu1 %v736_v31 }
  0xdf   :  { %744 = vsinq.f32 %v178_v53  ;;  %681 = vmatprep.subr.bf16.mxu1 %v831_v26 }
  0xe0   :  { %v276_v61 = vmul.f32 %v275_v56, %v273_v60 }
  0xe2   :  { %v277_v63 = vxor.u32 2147483648, %v276_v61  ;;  %682 = vmatpush3.bf16.msra.mxu1 %v737_v28 }
  0xe3   :  { %683 = vmatprep.subr.bf16.mxu1 %v831_v26 }
  0xe4   :  { %v278_v0 = vsel %vm195_vm0, %v277_v63, %v276_v61 }
  0xe5   :  { %v281_v1 = vsel %vm960_vm1, %v891_v32, %v278_v0  ;;  %v738_v32 = vld [vmem:[#allocation5 + $0x18] sm:$0xff]  }
  0xe6   :  { %746 = vcosq.f32 %v281_v1  ;;  %684 = vmatpush3.bf16.msra.mxu1 %v738_v32 }
  0xe7   :  { %748 = vsinq.f32 %v281_v1  ;;  %685 = vmatprep.subr.bf16.mxu1 %v831_v26 }
  0xea   :  { %686 = vmatpush3.bf16.msra.mxu1 %v739_v29 }
  0xeb   :  { %v743_v5 = vpop.eup %742  ;;  %687 = vmatprep.subr.bf16.mxu1 %v831_v26 }
  0xec   :  { %v745_v39 = vpop.eup %744  ;;  %v189_v10 = vxor.u32 2147483648, %v743_v5 }
  0xed   :  { %v186_v9 = vxor.u32 2147483648, %v745_v39 }
  0xee   :  { %v190_v12 = vsel %vm188_vm3, %v189_v10, %v745_v39  ;;  %688 = vmatpush3.bf16.msra.mxu1 %v740_v30 }
  0xef   :  { %v187_v11 = vsel %vm185_vm2, %v743_v5, %v186_v9  ;;  %689 = vmatprep.subr.bf16.mxu1 %v831_v26 }
  0xf0   :  { %v191_v14 = vsel %vm184_vm4, %v187_v11, %v190_v12 }
  0xf1   :  { %v192_v19 = vsel %vm182_vm6, nan, %v191_v14 }
  0xf2   :  { %v296_v23 = vpack.c.bf16 %v192_v19, %v192_v19  ;;  %690 = vmatpush3.bf16.msra.mxu1 %v741_v36 }
  0xf3   :  { %v747_v13 = vpop.eup %746 }
  0xf4   :  { %v749_v15 = vpop.eup %748  ;;  %v292_v16 = vxor.u32 2147483648, %v747_v13 }
  0xf5   :  { %v289_v17 = vxor.u32 2147483648, %v749_v15 }
  0xf6   :  { %v293_v18 = vsel %vm291_vm5, %v292_v16, %v749_v15 }
  0xf7   :  { %v290_v20 = vsel %vm288_vm7, %v747_v13, %v289_v17 }
  0xf8   :  { %v294_v21 = vsel %vm287_vm8, %v290_v20, %v293_v18 }
  0xf9   :  { %v295_v22 = vsel %vm285_vm9, nan, %v294_v21 }
  0xfa   :  { %v297_v24 = vpack.c.bf16 %v295_v22, %v295_v22 }
  0xfc   :  { %465 = vmatprep.mubr.bf16.mxu0 %v297_v24 }
  0xfd   :  { %466 = vmatmul.mubr.bf16.vlgmr.msra.gmra.mxu0 %v296_v23 }
 0x1bd   :  { %v660_v37 = vpop.f32.mrf.mxu0 }
 0x1bf   :  { %v661_v40 = vpop.f32.mrf.mxu0 }
 0x1c0   :  { %v662_v41 = vadd.f32 %v661_v40, %v660_v37 }
 0x1c1   :  { %v663_v42 = vpop.f32.mrf.mxu0 }
 0x1c2   :  { %v468_v43 = vadd.f32 %v662_v41, %v617_v38 }
 0x1c3   :  { %v664_v44 = vpop.f32.mrf.mxu0 }
 0x1c4   :  { %v634_v45 = vmul.f32 -1.442695, %v468_v43 }
 0x1c6   :  { %750 = vpow2.f32 %v634_v45 }
 0x1d3   :  { %v751_v46 = vpop.eup %750 }
 0x1d4   :  { %v476_v47 = vadd.f32 1.0, %v751_v46 }
 0x1d6   :  { %752 = vrcp.f32 %v476_v47 }
 0x1e3   :  { %v753_v48 = vpop.eup %752 }
 0x1e4   :  { %v479_v34 = vmul.f32 %v753_v48, %v468_v43 }
 0x1e6   :  { %v480_v35 = vpack.c.bf16 %v479_v34, %v479_v34 }
 0x1e8   :  { %692 = vmatmul.mubr.bf16.vlgmr.msra.gmra.mxu1 %v480_v35 }
 0x2a8   :  { %v586_v52 = vpop.f32.mrf.mxu1 }
 0x2a9   :  { %v587_v54 = vadd.f32 %v635_v49, %v586_v52 }
 0x2aa   :  { %v693_v57 = vpop.f32.mrf.mxu1 }
 0x2ab   :  { %592 = vst [vmem:[#allocation7] sm:$0xff] %v587_v54 }
 0x2ac   :  { %v589_v58 = vpop.f32.mrf.mxu1 }
 0x2ad   :  { %805 = shalt.err (!%p802_p0)
}
 0x2ae   :  { %602 = dma.vmem_to_hbm [thread:$0]  %s600_s4, 128, %s992_s7, [#allocation4]   ;;  %v694_v51 = vpop.f32.mrf.mxu1 }
 0x2af   :  { %818 = dma.done.wait [#allocation4], 128  }
 0x2b0   :  { %819 = vsyncadd [#allocation4], 4294967168 }
 0x2b1   :  { %606 = vsyncpa [#allocation3], 1 }
 0x2b2   :  { %607 = vsyncpa [#allocation6], 1 }
 0x2b3   :  { %608 = vsyncpa [#allocation4], 1 }

</bundles_post_ra>
